<compile_context>
chip_gen: v6e
topology: v6e:2x2x1
jax: 0.10.0
libtpu: 0.0.40
codegen_flags: <defaults>
</compile_context>

<pallas_src>
import functools

import jax
import jax.numpy as jnp
from jax.experimental import pallas as pl
from jax.experimental.pallas import tpu as pltpu


def _round_up(x, mult):
    return (x + mult - 1) // mult * mult


def _tpu_generation_config():
    """Best-effort per-generation defaults (TensorCores, VMEM cap, block size)."""
    kind = ""
    try:
        kind = jax.devices()[0].device_kind.lower()
    except Exception:
        pass
    if "v7" in kind:                                   # v7x: 64 MiB VMEM / TC, 2 TCs
        return dict(ncores=2, vmem_cap=44 << 20, target_block=5 << 20)
    if "v6" in kind:                                   # v6e: 1 TC, 128 MiB VMEM
        return dict(ncores=1, vmem_cap=96 << 20, target_block=12 << 20)
    if "v5" in kind and ("lite" in kind or "5e" in kind):   # v5e: 1 TC, 128 MiB
        return dict(ncores=1, vmem_cap=96 << 20, target_block=12 << 20)
    if "v4" in kind or "v5" in kind:                   # v4 / v5p megacore
        return dict(ncores=2, vmem_cap=96 << 20, target_block=10 << 20)
    return dict(ncores=1, vmem_cap=40 << 20, target_block=6 << 20)


def _make_dice_sums_kernel(row_tile, tile_m, cw, n_chunks, m,
                           steps_per_core, need_mask, need_gate):
    """Per-block accumulation kernel (all sizes are Python statics)."""
    unrolled = n_chunks <= 8   # short loops: static unroll; long: fori_loop

    def kernel(l_ref, t_ref, oi_ref, ol_ref, ot_ref):
        j = pl.program_id(2)                       # reduction step on this core

        # Zero this core's resident output accumulators on its first step.
        @pl.when(j == 0)
        def _():
            oi_ref[...] = jnp.zeros_like(oi_ref)
            ol_ref[...] = jnp.zeros_like(ol_ref)
            ot_ref[...] = jnp.zeros_like(ot_ref)

        # Unclamped global m-block id (index_map clamps the DMA separately).
        b = pl.program_id(0) * steps_per_core + j

        def chunk_sums(masked):
            if masked:
                block_base = b * tile_m
                lane = jax.lax.broadcasted_iota(jnp.int32, (row_tile, cw), 1)

            def step(lo, acc):
                acc_i, acc_l, acc_t = acc
                lc = l_ref[:, pl.ds(lo, cw)].astype(jnp.float32)
                tc = t_ref[:, pl.ds(lo, cw)].astype(jnp.float32)
                if masked:
                    # Zero lanes beyond the real data (boundary block only).
                    ok = lane < (m - block_base - lo)
                    lc = jnp.where(ok, lc, 0.0)
                    tc = jnp.where(ok, tc, 0.0)
                # Pure VPU work: no cross-lane reduction in the inner loop.
                return (acc_i + lc * tc, acc_l + lc, acc_t + tc)

            zeros = jnp.zeros((row_tile, cw), jnp.float32)
            acc = (zeros, zeros, zeros)
            if unrolled:
                for q in range(n_chunks):
                    acc = step(q * cw, acc)
            else:
                acc = jax.lax.fori_loop(
                    0, n_chunks,
                    lambda q, a: step(pl.multiple_of(q * cw, cw), a),
                    acc, unroll=4)
            return acc

        def accumulate(masked):
            acc_i, acc_l, acc_t = chunk_sums(masked)
            oi_ref[...] += acc_i[None]
            ol_ref[...] += acc_l[None]
            ot_ref[...] += acc_t[None]

        if not (need_mask or need_gate):
            accumulate(False)
        else:
            # Fast unmasked path: block fully inside the data.  This condition
            # also excludes clamped duplicate steps (they start at/after m).
            pl.when((b + 1) * tile_m <= m)(lambda: accumulate(False))
            if need_mask:
                # Masked path runs only for the single boundary block.
                pl.when(jnp.logical_and(b * tile_m < m,
                                        (b + 1) * tile_m > m))(
                    lambda: accumulate(True))

    return kernel


@functools.partial(jax.jit, static_argnames=("target_block_bytes",))
def dice_mean(logits, targets, *, target_block_bytes=None):
    """Pallas implementation of DiceMean.forward for NCDHW inputs."""
    assert logits.shape == targets.shape
    n, c = logits.shape[0], logits.shape[1]
    m0 = 1
    for s in logits.shape[2:]:
        m0 *= s
    rows0 = n * c

    itemsize = max(jnp.dtype(logits.dtype).itemsize,
                   jnp.dtype(targets.dtype).itemsize)
    sub = 8 * max(1, 4 // itemsize)               # sublane tile for this dtype

    # ---- sublane-packing fix: fold spatial into rows when N*C is tiny ------
    # (rows*f, m/f) is a free contiguous reshape; per-class sums recombined in
    # the epilogue.  Avoids 2-4x padded VMEM blocks / wasted VPU lanes.
    fold = 1
    if rows0 < sub:
        for f in range(2, sub + 1):
            if m0 % f == 0 and rows0 * f >= sub:
                fold = f
                break
    rows = rows0 * fold
    m = m0 // fold

    # Free, layout-preserving views: NCDHW is contiguous as (rows, m).
    l2 = logits.reshape(rows, m)
    t2 = targets.reshape(rows, m)

    cfg = _tpu_generation_config()
    if target_block_bytes is None:
        target_block_bytes = cfg["target_block"]

    # ---- row tiling: cap rows per block when N*C is large ------------------
    if rows <= 32:
        row_tile = rows
    else:
        row_tile = rows
        for cand in range(32, 7, -1):             # need multiple of 8 (or full)
            if cand % 8 == 0 and rows % cand == 0:
                row_tile = cand
                break
    n_row_blocks = rows // row_tile
    row_pad = _round_up(row_tile, 8)              # f32 vreg sublanes
    row_pad_mem = _round_up(row_tile, sub)        # VMEM tile padding

    # ---- chunk width: keep 2 loads + 3 accumulators within vreg budget -----
    cw = max(128, min(512, (4096 // row_pad) // 128 * 128))

    # ---- M tile: multi-MiB blocks, capped by the per-generation VMEM cap ---
    m_ceil = pl.cdiv(m, 128) * 128
    if m_ceil <= cw:
        tile_m = m_ceil
        cw = m_ceil
    else:
        per_lane = row_pad_mem * itemsize
        want = max(cw, target_block_bytes // per_lane // cw * cw)
        vmem_lanes = max(cw, (cfg["vmem_cap"] - (8 << 20))
                         // (4 * per_lane) // cw * cw)
        tile_m = min(want, vmem_lanes, pl.cdiv(m, cw) * cw)
    n_chunks = tile_m // cw

    nblocks = pl.cdiv(m, tile_m)
    ncores = cfg["ncores"] if nblocks >= 2 else 1
    steps = pl.cdiv(nblocks, ncores)
    need_gate = (ncores * steps) != nblocks       # clamped duplicate steps exist
    need_mask = (m % tile_m) != 0                 # boundary block overhangs

    # VMEM budget with *padded* rows: 2 inputs x 2 buffers x block + outputs.
    block_bytes = row_pad_mem * tile_m * itemsize
    out_block_bytes = row_pad * cw * 4
    vmem_limit = min(cfg["vmem_cap"],
                     max(32 << 20,
                         4 * block_bytes + 6 * out_block_bytes + (4 << 20)))

    def in_map(p, r, j):
        return (r, jnp.minimum(p * steps + j, nblocks - 1))  # clamp duplicates

    in_spec = pl.BlockSpec((row_tile, tile_m), in_map)
    out_spec = pl.BlockSpec((1, row_tile, cw), lambda p, r, j: (p, r, 0))
    out_shape = jax.ShapeDtypeStruct((ncores, rows, cw), jnp.float32)

    kernel = _make_dice_sums_kernel(row_tile, tile_m, cw, n_chunks, m,
                                    steps, need_mask, need_gate)

    inter, sl, st = pl.pallas_call(
        kernel,
        out_shape=(out_shape, out_shape, out_shape),
        grid_spec=pltpu.PrefetchScalarGridSpec(
            num_scalar_prefetch=0,
            grid=(ncores, n_row_blocks, steps),
            in_specs=[in_spec, in_spec],
            out_specs=(out_spec, out_spec, out_spec),
        ),
        compiler_params=pltpu.CompilerParams(
            dimension_semantics=("parallel", "parallel", "arbitrary"),
            vmem_limit_bytes=vmem_limit,
        ),
    )(l2, t2)

    # Tiny epilogue: finish the lane reduction + per-class combine in JAX.
    inter_c = inter.sum(axis=(0, 2)).reshape(n, c, fold).sum(axis=(0, 2))
    sl_c = sl.sum(axis=(0, 2)).reshape(n, c, fold).sum(axis=(0, 2))
    st_c = st.sum(axis=(0, 2)).reshape(n, c, fold).sum(axis=(0, 2))
    dice = (2.0 * inter_c + 1.0) / (sl_c + st_c + 1.0)
    return jnp.mean(dice)


def dice_mean_ref(logits, targets):
    """Pure-JAX reference matching the PyTorch module."""
    l = logits.astype(jnp.float32)
    t = targets.astype(jnp.float32)
    axes = (0,) + tuple(range(2, l.ndim))
    inter = jnp.sum(l * t, axis=axes)
    union = jnp.sum(l, axis=axes) + jnp.sum(t, axis=axes)
    return jnp.mean((2.0 * inter + 1.0) / (union + 1.0))


if __name__ == "__main__":
    key = jax.random.PRNGKey(0)

    # (shape, target_block_bytes override or None)
    cases = [
        ((2, 4, 8, 8, 8), None),           # exact tiling, single block
        ((1, 3, 8, 8, 7), None),           # rows<8 -> fold; partial block mask
        ((1, 2, 10, 25, 20), 16 * 1024),   # multi-block reduction (+2TC on v7x)
        ((2, 32, 4, 8, 8), None),          # many rows -> row-block grid axis
    ]

    for shape, blk in cases:
        key, k1, k2 = jax.random.split(key, 3)
        logits = jax.nn.softmax(
            jax.random.normal(k1, shape, dtype=jnp.float32), axis=1)
        targets = (jax.random.uniform(k2, shape, dtype=jnp.float32) > 0.5
                   ).astype(jnp.float32)

        if blk is None:
            out = dice_mean(logits, targets)
        else:
            out = dice_mean(logits, targets, target_block_bytes=blk)
        out = jax.block_until_ready(out)

        ref = dice_mean_ref(logits, targets)
        assert jnp.allclose(out, ref, rtol=1e-5, atol=1e-5), (shape, out, ref)

    print("KERNEL_OK")
</pallas_src>

<mosaic_0001>
module attributes {stable_mosaic.version = 11 : i64} {
  func.func @kernel(%arg0: i32, %arg1: i32, %arg2: i32, %arg3: memref<8x512xf32, #tpu.memory_space<vmem>>, %arg4: memref<8x512xf32, #tpu.memory_space<vmem>>, %arg5: memref<1x8x512xf32, #tpu.memory_space<vmem>>, %arg6: memref<1x8x512xf32, #tpu.memory_space<vmem>>, %arg7: memref<1x8x512xf32, #tpu.memory_space<vmem>>) attributes {dimension_semantics = [#tpu.dimension_semantics<parallel>, #tpu.dimension_semantics<parallel>, #tpu.dimension_semantics<arbitrary>], iteration_bounds = array<i64: 1, 1, 1>, scalar_prefetch = 0 : i64, scratch_operands = 0 : i64, tpu.core_type = #tpu.core_type<tc>, window_params = [{transform_indices = @transform_0, window_bounds = array<i64: 8, 512>}, {transform_indices = @transform_1, window_bounds = array<i64: 8, 512>}, {transform_indices = @transform_2, window_bounds = array<i64: 1, 8, 512>}, {transform_indices = @transform_3, window_bounds = array<i64: 1, 8, 512>}, {transform_indices = @transform_4, window_bounds = array<i64: 1, 8, 512>}]} {
    %c0_i32 = arith.constant 0 : i32
    %0 = arith.cmpi eq, %arg2, %c0_i32 : i32
    %1 = arith.extui %0 : i1 to i32
    %c0_i32_0 = arith.constant 0 : i32
    %2 = arith.cmpi ne, %1, %c0_i32_0 : i32
    scf.if %2 {
      %cst_22 = arith.constant 0.000000e+00 : f32
      %22 = vector.broadcast %cst_22 : f32 to vector<1x8x512xf32>
      %c0_23 = arith.constant 0 : index
      %c0_24 = arith.constant 0 : index
      %c0_25 = arith.constant 0 : index
      %23 = vector.load %arg5[%c0_23, %c0_24, %c0_25] : memref<1x8x512xf32, #tpu.memory_space<vmem>>, vector<1x8x512xf32>
      tpu.vector_store %arg5[%c0_23, %c0_24, %c0_25], %22 {strides = array<i32>} : memref<1x8x512xf32, #tpu.memory_space<vmem>>, vector<1x8x512xf32>,
      %cst_26 = arith.constant 0.000000e+00 : f32
      %24 = vector.broadcast %cst_26 : f32 to vector<1x8x512xf32>
      %c0_27 = arith.constant 0 : index
      %c0_28 = arith.constant 0 : index
      %c0_29 = arith.constant 0 : index
      %25 = vector.load %arg6[%c0_27, %c0_28, %c0_29] : memref<1x8x512xf32, #tpu.memory_space<vmem>>, vector<1x8x512xf32>
      tpu.vector_store %arg6[%c0_27, %c0_28, %c0_29], %24 {strides = array<i32>} : memref<1x8x512xf32, #tpu.memory_space<vmem>>, vector<1x8x512xf32>,
      %cst_30 = arith.constant 0.000000e+00 : f32
      %26 = vector.broadcast %cst_30 : f32 to vector<1x8x512xf32>
      %c0_31 = arith.constant 0 : index
      %c0_32 = arith.constant 0 : index
      %c0_33 = arith.constant 0 : index
      %27 = vector.load %arg7[%c0_31, %c0_32, %c0_33] : memref<1x8x512xf32, #tpu.memory_space<vmem>>, vector<1x8x512xf32>
      tpu.vector_store %arg7[%c0_31, %c0_32, %c0_33], %26 {strides = array<i32>} : memref<1x8x512xf32, #tpu.memory_space<vmem>>, vector<1x8x512xf32>,
    } else {
    }
    %cst = arith.constant 0.000000e+00 : f32
    %3 = vector.broadcast %cst : f32 to vector<8x512xf32>
    %c0 = arith.constant 0 : index
    %c0_1 = arith.constant 0 : index
    %4 = vector.load %arg3[%c0, %c0_1] : memref<8x512xf32, #tpu.memory_space<vmem>>, vector<8x512xf32>
    %c0_2 = arith.constant 0 : index
    %c0_3 = arith.constant 0 : index
    %5 = vector.load %arg4[%c0_2, %c0_3] : memref<8x512xf32, #tpu.memory_space<vmem>>, vector<8x512xf32>
    %6 = arith.mulf %4, %5 : vector<8x512xf32>
    %7 = arith.addf %3, %6 : vector<8x512xf32>
    %8 = arith.addf %3, %4 : vector<8x512xf32>
    %9 = arith.addf %3, %5 : vector<8x512xf32>
    %c0_4 = arith.constant 0 : index
    %c0_5 = arith.constant 0 : index
    %c0_6 = arith.constant 0 : index
    %10 = vector.load %arg5[%c0_4, %c0_5, %c0_6] : memref<1x8x512xf32, #tpu.memory_space<vmem>>, vector<1x8x512xf32>
    %11 = vector.shape_cast %7 : vector<8x512xf32> to vector<1x8x512xf32>
    %12 = arith.addf %10, %11 : vector<1x8x512xf32>
    %c0_7 = arith.constant 0 : index
    %c0_8 = arith.constant 0 : index
    %c0_9 = arith.constant 0 : index
    %13 = vector.load %arg5[%c0_7, %c0_8, %c0_9] : memref<1x8x512xf32, #tpu.memory_space<vmem>>, vector<1x8x512xf32>
    tpu.vector_store %arg5[%c0_7, %c0_8, %c0_9], %12 {strides = array<i32>} : memref<1x8x512xf32, #tpu.memory_space<vmem>>, vector<1x8x512xf32>,
    %c0_10 = arith.constant 0 : index
    %c0_11 = arith.constant 0 : index
    %c0_12 = arith.constant 0 : index
    %14 = vector.load %arg6[%c0_10, %c0_11, %c0_12] : memref<1x8x512xf32, #tpu.memory_space<vmem>>, vector<1x8x512xf32>
    %15 = vector.shape_cast %8 : vector<8x512xf32> to vector<1x8x512xf32>
    %16 = arith.addf %14, %15 : vector<1x8x512xf32>
    %c0_13 = arith.constant 0 : index
    %c0_14 = arith.constant 0 : index
    %c0_15 = arith.constant 0 : index
    %17 = vector.load %arg6[%c0_13, %c0_14, %c0_15] : memref<1x8x512xf32, #tpu.memory_space<vmem>>, vector<1x8x512xf32>
    tpu.vector_store %arg6[%c0_13, %c0_14, %c0_15], %16 {strides = array<i32>} : memref<1x8x512xf32, #tpu.memory_space<vmem>>, vector<1x8x512xf32>,
    %c0_16 = arith.constant 0 : index
    %c0_17 = arith.constant 0 : index
    %c0_18 = arith.constant 0 : index
    %18 = vector.load %arg7[%c0_16, %c0_17, %c0_18] : memref<1x8x512xf32, #tpu.memory_space<vmem>>, vector<1x8x512xf32>
    %19 = vector.shape_cast %9 : vector<8x512xf32> to vector<1x8x512xf32>
    %20 = arith.addf %18, %19 : vector<1x8x512xf32>
    %c0_19 = arith.constant 0 : index
    %c0_20 = arith.constant 0 : index
    %c0_21 = arith.constant 0 : index
    %21 = vector.load %arg7[%c0_19, %c0_20, %c0_21] : memref<1x8x512xf32, #tpu.memory_space<vmem>>, vector<1x8x512xf32>
    tpu.vector_store %arg7[%c0_19, %c0_20, %c0_21], %20 {strides = array<i32>} : memref<1x8x512xf32, #tpu.memory_space<vmem>>, vector<1x8x512xf32>,
    return
  }
  func.func @transform_0(%arg0: i32, %arg1: i32, %arg2: i32) -> (i32, i32) {
    %c1_i32 = arith.constant 1 : i32
    %0 = arith.muli %arg0, %c1_i32 : i32
    %1 = arith.addi %0, %arg2 : i32
    %c0_i32 = arith.constant 0 : i32
    %2 = arith.minsi %1, %c0_i32 : i32
    %c0_i32_0 = arith.constant 0 : i32
    return %arg1, %2 : i32, i32
  }
  func.func @transform_1(%arg0: i32, %arg1: i32, %arg2: i32) -> (i32, i32) {
    %c1_i32 = arith.constant 1 : i32
    %0 = arith.muli %arg0, %c1_i32 : i32
    %1 = arith.addi %0, %arg2 : i32
    %c0_i32 = arith.constant 0 : i32
    %2 = arith.minsi %1, %c0_i32 : i32
    %c0_i32_0 = arith.constant 0 : i32
    return %arg1, %2 : i32, i32
  }
  func.func @transform_2(%arg0: i32, %arg1: i32, %arg2: i32) -> (i32, i32, i32) {
    %c0_i32 = arith.constant 0 : i32
    %c0_i32_0 = arith.constant 0 : i32
    return %arg0, %arg1, %c0_i32 : i32, i32, i32
  }
  func.func @transform_3(%arg0: i32, %arg1: i32, %arg2: i32) -> (i32, i32, i32) {
    %c0_i32 = arith.constant 0 : i32
    %c0_i32_0 = arith.constant 0 : i32
    return %arg0, %arg1, %c0_i32 : i32, i32, i32
  }
  func.func @transform_4(%arg0: i32, %arg1: i32, %arg2: i32) -> (i32, i32, i32) {
    %c0_i32 = arith.constant 0 : i32
    %c0_i32_0 = arith.constant 0 : i32
    return %arg0, %arg1, %c0_i32 : i32, i32, i32
  }
}

</mosaic_0001>

<bundles_post_ra>
// kernel: dice_mean.1
= control target key start
LH: loop header
LB: loop body
LE: loop exit
PB: predicated region body
PF: predicated region fallthrough
CT: control target
= control target key end

     0   :  { %s264_s0 = inlined_call_operand.vmem [shape: f32[8,512], index: 0, kind: input, shape index: {}]   ;;  %s265_s1 = inlined_call_operand.vmem [shape: f32[8,512], index: 1, kind: input, shape index: {}]   ;;  %s266_s3 = inlined_call_operand.vmem [shape: f32[1,8,512], index: 3, kind: output, shape index: {1}]   ;;  %s267_s4 = inlined_call_operand.vmem [shape: f32[1,8,512], index: 4, kind: output, shape index: {2}]   ;;  %s268_s2 = inlined_call_operand.vmem [shape: f32[1,8,512], index: 2, kind: output, shape index: {0}]  }
   0x1   :  { %v94_v0 = vld [vmem:[%s264_s0] sm:$0xff]  ;;  %v95_v2 = vld [vmem:[%s264_s0 + $0x8] sm:$0xff]  ;;  %v96_v5 = vld [vmem:[%s264_s0 + $0x10] sm:$0xff] }
   0x2   :  { %v98_v1 = vld [vmem:[%s265_s1] sm:$0xff]  ;;  %v99_v4 = vld [vmem:[%s265_s1 + $0x8] sm:$0xff]  ;;  %v100_v6 = vld [vmem:[%s265_s1 + $0x10] sm:$0xff]  ;;  %138 = vst [vmem:[%s266_s3] sm:$0xff] %v94_v0 }
   0x3   :  { %v102_v3 = vmul.f32 %v98_v1, %v94_v0  ;;  %v103_v7 = vmul.f32 %v99_v4, %v95_v2  ;;  %v104_v8 = vmul.f32 %v100_v6, %v96_v5  ;;  %v97_v9 = vld [vmem:[%s264_s0 + $0x18] sm:$0xff]  ;;  %139 = vst [vmem:[%s266_s3 + $0x8] sm:$0xff] %v95_v2  ;;  %150 = vst [vmem:[%s267_s4] sm:$0xff] %v98_v1 }
   0x4   :  { %v101_v10 = vld [vmem:[%s265_s1 + $0x18] sm:$0xff]  ;;  %140 = vst [vmem:[%s266_s3 + $0x10] sm:$0xff] %v96_v5  ;;  %151 = vst [vmem:[%s267_s4 + $0x8] sm:$0xff] %v99_v4 }
   0x5   :  { %v105_v11 = vmul.f32 %v101_v10, %v97_v9  ;;  %126 = vst [vmem:[%s268_s2] sm:$0xff] %v102_v3  ;;  %141 = vst [vmem:[%s266_s3 + $0x18] sm:$0xff] %v97_v9 }
   0x6   :  { %152 = vst [vmem:[%s267_s4 + $0x10] sm:$0xff] %v100_v6  ;;  %127 = vst [vmem:[%s268_s2 + $0x8] sm:$0xff] %v103_v7 }
   0x7   :  { %128 = vst [vmem:[%s268_s2 + $0x10] sm:$0xff] %v104_v8  ;;  %153 = vst [vmem:[%s267_s4 + $0x18] sm:$0xff] %v101_v10 }
   0x8   :  { %129 = vst [vmem:[%s268_s2 + $0x18] sm:$0xff] %v105_v11 }

</bundles_post_ra>
